<compile_context>
chip_gen: v5e
topology: v5e:2x2
jax: 0.10.0
libtpu: 0.0.40
codegen_flags: <defaults>
</compile_context>

<pallas_src>
import functools

import jax
import jax.numpy as jnp
from jax import lax
from jax.experimental import pallas as pl
from jax.experimental.pallas import tpu as pltpu


def _round_up(n, m):
    return ((n + m - 1) // m) * m


def _ln_kernel(x_ref, g_ref, b_ref, o_ref, *, eps, hidden):
    """One (tile, hidden) block; each row is an independent LayerNorm."""
    x = x_ref[...].astype(jnp.float32)
    inv_h = 1.0 / float(hidden)
    mean = jnp.sum(x, axis=-1, keepdims=True) * inv_h
    c = x - mean
    var = jnp.sum(c * c, axis=-1, keepdims=True) * inv_h
    inv = lax.rsqrt(var + eps)
    y = c * inv * g_ref[...].astype(jnp.float32) + b_ref[...].astype(jnp.float32)
    o_ref[...] = y.astype(o_ref.dtype)


def _ln_packed_kernel(x_ref, g_ref, b_ref, s_ref, o_ref, *, eps, hidden):
    """pack > 1: `pack` rows of width `hidden` folded into one 128-lane row.

    Per-segment sums are computed with two small MXU matmuls against the
    block-diagonal ones matrix S (S[j,k] = 1 iff lanes j,k share a hidden
    segment); the result is already broadcast across each segment's lanes,
    so the normalize is a couple of VPU passes and the kernel is HBM-bound.
    """
    x = x_ref[...].astype(jnp.float32)
    s = s_ref[...]
    inv_h = 1.0 / float(hidden)
    mean_b = jnp.dot(x, s, preferred_element_type=jnp.float32,
                     precision=lax.Precision.HIGHEST) * inv_h
    c = x - mean_b
    var_b = jnp.dot(c * c, s, preferred_element_type=jnp.float32,
                    precision=lax.Precision.HIGHEST) * inv_h
    inv_b = lax.rsqrt(var_b + eps)
    y = c * inv_b * g_ref[...].astype(jnp.float32) \
        + b_ref[...].astype(jnp.float32)
    o_ref[...] = y.astype(o_ref.dtype)


def _vmem_capacity_bytes():
    try:
        info = pltpu.get_tpu_info()
        cap = getattr(info, "vmem_capacity_bytes", None)
        if cap:
            return int(cap)
    except Exception:
        pass
    return 64 << 20  # conservative (v7x-sized) fallback


def layer_norm_pallas(x, gamma, beta, *, eps=1e-6, row_tile=1024):
    """LayerNorm over the last axis of x (any leading shape)."""
    orig_shape = x.shape
    hidden = orig_shape[-1]
    x2 = x.reshape(-1, hidden)
    rows = x2.shape[0]

    # Lane-dense packing: fold `pack` consecutive rows into one 128-lane row
    # when the feature dim is narrow, so loads/stores use full, unmasked vregs.
    pack = 1
    if 8 <= hidden < 128 and 128 % hidden == 0 and rows % (128 // hidden) == 0:
        pack = 128 // hidden
    width = pack * hidden
    prows = rows // pack

    xw = x2.reshape(prows, width)
    gw = jnp.tile(gamma.reshape(1, hidden), (1, pack))
    bw = jnp.tile(beta.reshape(1, hidden), (1, pack))

    itemsize = jnp.dtype(x.dtype).itemsize
    sublane = {1: 32, 2: 16, 4: 8}.get(itemsize, 8)  # dtype sublane packing

    # Generation-aware row-tile cap.  Pipelined footprint per tile is roughly
    # 2x(in) + 2x(out) native-dtype buffers plus ~3 f32 working copies
    # (x in f32, centered, y) of the tile.
    vmem_cap = _vmem_capacity_bytes()
    budget = (28 << 20) if vmem_cap <= (64 << 20) else (80 << 20)
    per_row_bytes = width * (4 * itemsize + 3 * 4)
    cap_rows = max(sublane, ((budget // per_row_bytes) // sublane) * sublane)

    if prows <= sublane:
        tile = prows                     # single full-extent block
    else:
        # At least 2 grid steps so v7x's two TensorCores can both stream HBM.
        half = _round_up(pl.cdiv(prows, 2), sublane)
        tile = min(int(row_tile), cap_rows, half)
        tile = max(sublane, (tile // sublane) * sublane)

    grid = (pl.cdiv(prows, tile),)       # ragged last block; no host-side pad

    tile_in_bytes = tile * width * itemsize
    tile_f32_bytes = tile * width * 4
    vmem_limit = int(max(4 * tile_in_bytes + 3 * tile_f32_bytes + (4 << 20),
                         32 << 20))

    x_spec = pl.BlockSpec((tile, width), lambda i: (i, 0))
    vec_spec = pl.BlockSpec((1, width), lambda i: (0, 0))
    out_spec = pl.BlockSpec((tile, width), lambda i: (i, 0))

    if pack == 1:
        kernel = functools.partial(_ln_kernel, eps=eps, hidden=hidden)
        in_specs = [x_spec, vec_spec, vec_spec]
        args = (xw, gw, bw)
    else:
        lane = jnp.arange(width)
        seg_sum = (lane[:, None] // hidden == lane[None, :] // hidden)
        seg_sum = seg_sum.astype(jnp.float32)        # (width, width), width=128
        kernel = functools.partial(_ln_packed_kernel, eps=eps, hidden=hidden)
        in_specs = [x_spec, vec_spec, vec_spec,
                    pl.BlockSpec((width, width), lambda i: (0, 0))]
        args = (xw, gw, bw, seg_sum)

    out = pl.pallas_call(
        kernel,
        out_shape=jax.ShapeDtypeStruct((prows, width), x.dtype),
        grid_spec=pltpu.PrefetchScalarGridSpec(
            num_scalar_prefetch=0,
            grid=grid,
            in_specs=in_specs,
            out_specs=out_spec,
        ),
        compiler_params=pltpu.CompilerParams(
            dimension_semantics=("parallel",),
            vmem_limit_bytes=vmem_limit,
        ),
    )(*args)

    return out.reshape(orig_shape)


if __name__ == "__main__":
    key = jax.random.PRNGKey(0)
    k0, k1 = jax.random.split(key)

    def reference(x, gamma, beta, eps):
        mean = jnp.mean(x, axis=-1, keepdims=True)
        var = jnp.mean((x - mean) ** 2, axis=-1, keepdims=True)
        return (x - mean) * lax.rsqrt(var + eps) * gamma + beta

    # Shapes implied by the module usage: [batch, seq, features], features=32.
    batch, seq, hidden = 2, 8, 32
    eps = 1e-6

    x = jax.random.normal(k0, (batch, seq, hidden), dtype=jnp.float32)
    gamma = jnp.ones((hidden,), dtype=jnp.float32)   # a_2 default init
    beta = jnp.zeros((hidden,), dtype=jnp.float32)   # b_2 default init

    y = layer_norm_pallas(x, gamma, beta, eps=eps)
    jax.block_until_ready(y)
    assert jnp.allclose(y, reference(x, gamma, beta, eps), atol=1e-5, rtol=1e-5)

    # Awkward row count: exercises the ragged-last-block path + pack=1 fallback.
    x2 = jax.random.normal(k1, (3, 5, hidden), dtype=jnp.float32)
    y2 = layer_norm_pallas(x2, gamma, beta, eps=eps)
    jax.block_until_ready(y2)
    assert jnp.allclose(y2, reference(x2, gamma, beta, eps), atol=1e-5, rtol=1e-5)

    print("KERNEL_OK")
</pallas_src>

<mosaic_0001>
module attributes {stable_mosaic.version = 11 : i64} {
  func.func @_ln_packed_kernel(%arg0: i32, %arg1: memref<4x128xf32, #tpu.memory_space<vmem>>, %arg2: memref<1x128xf32, #tpu.memory_space<vmem>>, %arg3: memref<1x128xf32, #tpu.memory_space<vmem>>, %arg4: memref<128x128xf32, #tpu.memory_space<vmem>>, %arg5: memref<4x128xf32, #tpu.memory_space<vmem>>) attributes {dimension_semantics = [#tpu.dimension_semantics<parallel>], iteration_bounds = array<i64: 1>, scalar_prefetch = 0 : i64, scratch_operands = 0 : i64, tpu.core_type = #tpu.core_type<tc>, window_params = [{transform_indices = @transform_0, window_bounds = array<i64: 4, 128>}, {pipeline_mode = #tpu.pipeline_mode<synchronous>, transform_indices = @transform_1, window_bounds = array<i64: 1, 128>}, {pipeline_mode = #tpu.pipeline_mode<synchronous>, transform_indices = @transform_2, window_bounds = array<i64: 1, 128>}, {pipeline_mode = #tpu.pipeline_mode<synchronous>, transform_indices = @transform_3, window_bounds = array<i64: 128, 128>}, {transform_indices = @transform_4, window_bounds = array<i64: 4, 128>}]} {
    %c0 = arith.constant 0 : index
    %c0_0 = arith.constant 0 : index
    %0 = vector.load %arg1[%c0, %c0_0] : memref<4x128xf32, #tpu.memory_space<vmem>>, vector<4x128xf32>
    %c0_1 = arith.constant 0 : index
    %c0_2 = arith.constant 0 : index
    %1 = vector.load %arg4[%c0_1, %c0_2] : memref<128x128xf32, #tpu.memory_space<vmem>>, vector<128x128xf32>
    %cst = arith.constant dense<0.000000e+00> : vector<4x128xf32>
    %2 = tpu.matmul %0, %1, %cst {dimension_numbers = #tpu.dot_dimension_numbers<[1], [0], [0], [1], [0, 0, 1, 1], [], []>, precision = #tpu.contract_precision<fp32>} : vector<4x128xf32>, vector<128x128xf32>, vector<4x128xf32> -> vector<4x128xf32>
    %cst_3 = arith.constant 3.125000e-02 : f32
    %3 = vector.broadcast %cst_3 : f32 to vector<4x128xf32>
    %4 = arith.mulf %2, %3 : vector<4x128xf32>
    %5 = arith.subf %0, %4 : vector<4x128xf32>
    %6 = arith.mulf %5, %5 : vector<4x128xf32>
    %cst_4 = arith.constant dense<0.000000e+00> : vector<4x128xf32>
    %7 = tpu.matmul %6, %1, %cst_4 {dimension_numbers = #tpu.dot_dimension_numbers<[1], [0], [0], [1], [0, 0, 1, 1], [], []>, precision = #tpu.contract_precision<fp32>} : vector<4x128xf32>, vector<128x128xf32>, vector<4x128xf32> -> vector<4x128xf32>
    %cst_5 = arith.constant 3.125000e-02 : f32
    %8 = vector.broadcast %cst_5 : f32 to vector<4x128xf32>
    %9 = arith.mulf %7, %8 : vector<4x128xf32>
    %cst_6 = arith.constant 9.99999997E-7 : f32
    %10 = vector.broadcast %cst_6 : f32 to vector<4x128xf32>
    %11 = arith.addf %9, %10 : vector<4x128xf32>
    %12 = math.rsqrt %11 : vector<4x128xf32>
    %13 = arith.mulf %5, %12 : vector<4x128xf32>
    %c0_7 = arith.constant 0 : index
    %c0_8 = arith.constant 0 : index
    %14 = vector.load %arg2[%c0_7, %c0_8] : memref<1x128xf32, #tpu.memory_space<vmem>>, vector<1x128xf32>
    %15 = vector.broadcast %14 : vector<1x128xf32> to vector<4x128xf32>
    %16 = arith.mulf %13, %15 : vector<4x128xf32>
    %c0_9 = arith.constant 0 : index
    %c0_10 = arith.constant 0 : index
    %17 = vector.load %arg3[%c0_9, %c0_10] : memref<1x128xf32, #tpu.memory_space<vmem>>, vector<1x128xf32>
    %18 = vector.broadcast %17 : vector<1x128xf32> to vector<4x128xf32>
    %19 = arith.addf %16, %18 : vector<4x128xf32>
    %c0_11 = arith.constant 0 : index
    %c0_12 = arith.constant 0 : index
    %20 = vector.load %arg5[%c0_11, %c0_12] : memref<4x128xf32, #tpu.memory_space<vmem>>, vector<4x128xf32>
    tpu.vector_store %arg5[%c0_11, %c0_12], %19 {strides = array<i32>} : memref<4x128xf32, #tpu.memory_space<vmem>>, vector<4x128xf32>,
    return
  }
  func.func @transform_0(%arg0: i32) -> (i32, i32) {
    %c0_i32 = arith.constant 0 : i32
    %c0_i32_0 = arith.constant 0 : i32
    return %arg0, %c0_i32 : i32, i32
  }
  func.func @transform_1(%arg0: i32) -> (i32, i32) {
    %c0_i32 = arith.constant 0 : i32
    %c0_i32_0 = arith.constant 0 : i32
    %c0_i32_1 = arith.constant 0 : i32
    return %c0_i32, %c0_i32_0 : i32, i32
  }
  func.func @transform_2(%arg0: i32) -> (i32, i32) {
    %c0_i32 = arith.constant 0 : i32
    %c0_i32_0 = arith.constant 0 : i32
    %c0_i32_1 = arith.constant 0 : i32
    return %c0_i32, %c0_i32_0 : i32, i32
  }
  func.func @transform_3(%arg0: i32) -> (i32, i32) {
    %c0_i32 = arith.constant 0 : i32
    %c0_i32_0 = arith.constant 0 : i32
    %c0_i32_1 = arith.constant 0 : i32
    return %c0_i32, %c0_i32_0 : i32, i32
  }
  func.func @transform_4(%arg0: i32) -> (i32, i32) {
    %c0_i32 = arith.constant 0 : i32
    %c0_i32_0 = arith.constant 0 : i32
    return %arg0, %c0_i32 : i32, i32
  }
}

</mosaic_0001>

<bundles_post_ra>
// kernel: tpu_custom_call.1
= control target key start
LH: loop header
LB: loop body
LE: loop exit
PB: predicated region body
PF: predicated region fallthrough
CT: control target
= control target key end

     0   :  { %9 = vsyncpa [#allocation3], 0  ;;  %s1358_s0 = inlined_call_operand.hbm [shape: f32[4,128], index: 0, kind: input, shape index: {}]   ;;  %s1359_s1 = inlined_call_operand.hbm [shape: f32[1,128], index: 1, kind: input, shape index: {}]   ;;  %s1360_s2 = inlined_call_operand.vmem [shape: f32[1,128], index: 2, kind: input, shape index: {}]   ;;  %s1361_s3 = inlined_call_operand.hbm [shape: f32[128,128], index: 3, kind: input, shape index: {}]   ;;  %s1362_s4 = inlined_call_operand.hbm [shape: f32[4,128], index: 4, kind: output, shape index: {}]  }
   0x1   :  { %10 = vsyncpa [#allocation6], 0  ;;  %s28_s17 = sshll.u32 %s1359_s1, 4  ;;  %s29_s17 = int_to_ptr.hbm [resolvable:$true] %s28_s17 }
   0x2   :  { %11 = vsyncpa [#allocation4], 0  ;;  %s917_s18 = smov [#allocation5]   ;;  %s17_s22 = sshll.u32 %s1358_s0, 4  ;;  %s18_s22 = int_to_ptr.hbm [resolvable:$true] %s17_s22 }
   0x3   :  { %s30_s19 = sshll.u32 %s917_s18, 4  ;;  %s918_s23 = smov [#allocation2]   ;;  %s31_s19 = int_to_ptr.vmem [resolvable:$true] %s30_s19 }
   0x4   :  { %33 = dma.hbm_to_vmem [thread:$0]  %s29_s17, 16, %s31_s19, [#allocation6]  }
   0x5   :  { %s19_s24 = sshll.u32 %s918_s23, 4  ;;  %s40_s27 = sshll.u32 %s1361_s3, 4  ;;  %s20_s24 = int_to_ptr.vmem [resolvable:$true] %s19_s24  ;;  %s41_s27 = int_to_ptr.hbm [resolvable:$true] %s40_s27 }
   0x6   :  { %22 = dma.hbm_to_vmem [thread:$0]  %s18_s22, 64, %s20_s24, [#allocation3]  }
   0x7   :  { %s919_s1 = smov [#allocation7]   ;;  %s920_s29 = smov 128  }
   0x8   :  { %s42_s28 = sshll.u32 %s919_s1, 4  ;;  %s921_s30 = smov 8   ;;  %s43_s28 = int_to_ptr.vmem [resolvable:$true] %s42_s28 }
   0x9   :  { %48 = dma.hbm_to_vmem [thread:$0]  %s41_s27, 2048, %s43_s28, [#allocation6], %s920_s29, %s920_s29, %s921_s30  }
   0xa   :  { %911 = dma.done.wait [#allocation3], 64  }
   0xb   :  { %912 = vsyncadd [#allocation3], 4294967232 }
   0xc   :  { %913 = dma.done.wait [#allocation6], 2064  }
   0xd   :  { %914 = vsyncadd [#allocation6], 4294965232  ;;  %v77_v0 = vld [vmem:[#allocation7 + $0x78] sm:$0xff]  ;;  %v76_v1 = vld [vmem:[#allocation7 + $0x70] sm:$0xff]  ;;  %s922_s5 = smov [#allocation8]   ;;  %s794_s9 = sshll.u32 %s1362_s4, 4  ;;  %s795_s9 = int_to_ptr.hbm [resolvable:$true] %s794_s9 }
   0xe   :  { %v75_v2 = vld [vmem:[#allocation7 + $0x68] sm:$0xff]  ;;  %v957_v3 = vand.u32 4294901760, %v77_v0  ;;  %v959_v4 = vand.u32 4294901760, %v76_v1  ;;  %v74_v6 = vld [vmem:[#allocation7 + $0x60] sm:$0xff]  ;;  %v73_v7 = vld [vmem:[#allocation7 + $0x58] sm:$0xff]  ;;  %s792_s6 = sshll.u32 %s922_s5, 4  ;;  %s793_s6 = int_to_ptr.vmem [resolvable:$true] %s792_s6 }
   0xf   :  { %v961_v5 = vand.u32 4294901760, %v75_v2  ;;  %v72_v8 = vld [vmem:[#allocation7 + $0x50] sm:$0xff]  ;;  %v963_v9 = vand.u32 4294901760, %v74_v6  ;;  %v965_v10 = vand.u32 4294901760, %v73_v7  ;;  %v71_v12 = vld [vmem:[#allocation7 + $0x48] sm:$0xff]  ;;  %v70_v13 = vld [vmem:[#allocation7 + $0x40] sm:$0xff] }
  0x10   :  { %v967_v11 = vand.u32 4294901760, %v72_v8  ;;  %79 = vmatpush.msra.mxu0 %v957_v3  ;;  %v971_v14 = vsub.f32 %v77_v0, %v957_v3  ;;  %v974_v15 = vsub.f32 %v76_v1, %v959_v4  ;;  %v979_v17 = vand.u32 4294901760, %v71_v12  ;;  %v69_v18 = vld [vmem:[#allocation7 + $0x38] sm:$0xff]  ;;  %275 = vmatpush.msra.mxu3 %v957_v3  ;;  %v68_v26 = vld [vmem:[#allocation7 + $0x30] sm:$0xff]  ;;  %v67_v36 = vld [vmem:[#allocation7 + $0x28] sm:$0xff] }
  0x11   :  { %v977_v16 = vsub.f32 %v75_v2, %v961_v5  ;;  %v983_v19 = vsub.f32 %v74_v6, %v963_v9  ;;  %v986_v20 = vsub.f32 %v73_v7, %v965_v10  ;;  %v1001_v25 = vand.u32 4294901760, %v70_v13  ;;  %v66_v42 = vld [vmem:[#allocation7 + $0x20] sm:$0xff]  ;;  %v65_v47 = vld [vmem:[#allocation7 + $0x18] sm:$0xff]  ;;  %v64_v55 = vld [vmem:[#allocation7 + $0x10] sm:$0xff] }
  0x12   :  { %v989_v21 = vsub.f32 %v72_v8, %v967_v11  ;;  %81 = vmatpush.msra.mxu0 %v959_v4  ;;  %v993_v22 = vand.u32 4294901760, %v971_v14  ;;  %v996_v23 = vand.u32 4294901760, %v974_v15  ;;  %222 = vmatpush.msra.mxu2 %v971_v14  ;;  %v1007_v28 = vand.u32 4294901760, %v69_v18  ;;  %v63_v60 = vld [vmem:[#allocation7 + $0x8] sm:$0xff]  ;;  %v62_v1 = vld [vmem:[#allocation7] sm:$0xff] }
  0x13   :  { %v999_v24 = vand.u32 4294901760, %v977_v16  ;;  %v1005_v27 = vand.u32 4294901760, %v983_v19  ;;  %v1010_v29 = vsub.f32 %v71_v12, %v979_v17  ;;  %277 = vmatpush.msra.mxu3 %v959_v4  ;;  %v1021_v33 = vand.u32 4294901760, %v986_v20  ;;  %v1111_v7 = vld [vmem:[#allocation2] sm:$0xf] }
  0x14   :  { %83 = vmatpush.msra.mxu0 %v961_v5  ;;  %v122_v30 = vsub.f32 %v971_v14, %v993_v22  ;;  %v128_v31 = vsub.f32 %v974_v15, %v996_v23  ;;  %225 = vmatpush.msra.mxu2 %v974_v15  ;;  %v1025_v34 = vand.u32 4294901760, %v989_v21  ;;  %v1027_v35 = vand.u32 4294901760, %v68_v26  ;;  %1377 = vst [vmem:[#allocation18_spill] sm:$0xff] %v1111_v7 }
  0x15   :  { %v134_v32 = vsub.f32 %v977_v16, %v999_v24  ;;  %279 = vmatpush.msra.mxu3 %v961_v5  ;;  %v140_v39 = vsub.f32 %v983_v19, %v1005_v27  ;;  %v1038_v40 = vsub.f32 %v70_v13, %v1001_v25  ;;  %v1042_v41 = vand.u32 4294901760, %v1010_v29 }
  0x16   :  { %v1030_v37 = vand.u32 4294901760, %v122_v30  ;;  %85 = vmatpush.msra.mxu0 %v963_v9  ;;  %v1033_v38 = vand.u32 4294901760, %v128_v31  ;;  %228 = vmatpush.msra.mxu2 %v977_v16  ;;  %v146_v44 = vsub.f32 %v986_v20, %v1021_v33  ;;  %v1051_v45 = vand.u32 4294901760, %v67_v36 }
  0x17   :  { %1371 = vst [vmem:[#allocation12_spill] sm:$0xff] %v1038_v40  ;;  %281 = vmatpush.msra.mxu3 %v963_v9  ;;  %v1047_v43 = vand.u32 4294901760, %v134_v32  ;;  %v1054_v46 = vsub.f32 %v69_v18, %v1007_v28  ;;  %v152_v48 = vsub.f32 %v989_v21, %v1025_v34  ;;  %v1062_v49 = vand.u32 4294901760, %v140_v39 }
  0x18   :  { %124 = vmatpush.msra.mxu1 %v1030_v37  ;;  %87 = vmatpush.msra.mxu0 %v965_v10  ;;  %v1065_v50 = vand.u32 4294901760, %v1038_v40  ;;  %v1067_v51 = vand.u32 4294901760, %v66_v42  ;;  %v1070_v52 = vsub.f32 %v68_v26, %v1027_v35  ;;  %v158_v53 = vsub.f32 %v1010_v29, %v1042_v41 }
  0x19   :  { %1372 = vst [vmem:[#allocation13_spill] sm:$0xff] %v1054_v46  ;;  %231 = vmatpush.msra.mxu2 %v983_v19  ;;  %283 = vmatpush.msra.mxu3 %v965_v10  ;;  %v1074_v54 = vand.u32 4294901760, %v65_v47  ;;  %v1080_v56 = vand.u32 4294901760, %v146_v44  ;;  %v1083_v57 = vand.u32 4294901760, %v1054_v46  ;;  %v1086_v58 = vsub.f32 %v67_v36, %v1051_v45 }
  0x1a   :  { %130 = vmatpush.msra.mxu1 %v1033_v38  ;;  %89 = vmatpush.msra.mxu0 %v967_v11  ;;  %1373 = vst [vmem:[#allocation14_spill] sm:$0xff] %v1070_v52  ;;  %v1088_v59 = vand.u32 4294901760, %v152_v48  ;;  %v164_v61 = vsub.f32 %v1038_v40, %v1065_v50  ;;  %v1097_v62 = vand.u32 4294901760, %v1070_v52  ;;  %v1099_v63 = vand.u32 4294901760, %v64_v55 }
  0x1b   :  { %234 = vmatpush.msra.mxu2 %v986_v20  ;;  %285 = vmatpush.msra.mxu3 %v967_v11  ;;  %1374 = vst [vmem:[#allocation15_spill] sm:$0xff] %v1086_v58  ;;  %v1102_v0 = vsub.f32 %v66_v42, %v1067_v51  ;;  %v1104_v2 = vand.u32 4294901760, %v158_v53  ;;  %v1107_v6 = vsub.f32 %v65_v47, %v1074_v54  ;;  %v1118_v12 = vand.u32 4294901760, %v1086_v58 }
  0x1c   :  { %136 = vmatpush.msra.mxu1 %v1047_v43  ;;  %91 = vmatpush.msra.mxu0 %v979_v17  ;;  %v170_v8 = vsub.f32 %v1054_v46, %v1083_v57  ;;  %v1120_v13 = vand.u32 4294901760, %v63_v60  ;;  %v1123_v18 = vand.u32 4294901760, %v1111_v7  ;;  %v1125_v26 = vand.u32 4294901760, %v62_v1 }
  0x1d   :  { %237 = vmatpush.msra.mxu2 %v989_v21  ;;  %287 = vmatpush.msra.mxu3 %v979_v17  ;;  %1375 = vst [vmem:[#allocation16_spill] sm:$0xff] %v1102_v0  ;;  %v1131_v30 = vand.u32 4294901760, %v164_v61  ;;  %v176_v31 = vsub.f32 %v1070_v52, %v1097_v62  ;;  %v1136_v32 = vand.u32 4294901760, %v1102_v0  ;;  %v1139_v36 = vsub.f32 %v64_v55, %v1099_v63 }
  0x1e   :  { %142 = vmatpush.msra.mxu1 %v1062_v49  ;;  %93 = vmatpush.msra.mxu0 %v1001_v25  ;;  %1376 = vst [vmem:[#allocation17_spill] sm:$0xff] %v1107_v6  ;;  %v1142_v39 = vand.u32 4294901760, %v1107_v6  ;;  %v1148_v42 = vand.u32 4294901760, %v170_v8  ;;  %v182_v44 = vsub.f32 %v1086_v58, %v1118_v12  ;;  %v1153_v47 = vsub.f32 %v63_v60, %v1120_v13 }
  0x1f   :  { %240 = vmatpush.msra.mxu2 %v1010_v29  ;;  %289 = vmatpush.msra.mxu3 %v1001_v25  ;;  %1378 = vst [vmem:[#allocation19_spill] sm:$0xff] %v1139_v36  ;;  %v111_v48 = vsub.f32 %v1111_v7, %v1123_v18  ;;  %v1161_v53 = vand.u32 4294901760, %v176_v31  ;;  %v188_v55 = vsub.f32 %v1102_v0, %v1136_v32  ;;  %v1166_v61 = vand.u32 4294901760, %v1139_v36 }
  0x20   :  { %148 = vmatpush.msra.mxu1 %v1080_v56  ;;  %95 = vmatpush.msra.mxu0 %v1007_v28  ;;  %v1169_v60 = vsub.f32 %v62_v1, %v1125_v26  ;;  %v1175_v8 = vand.u32 4294901760, %v182_v44  ;;  %v194_v31 = vsub.f32 %v1107_v6, %v1142_v39  ;;  %v1180_v7 = vand.u32 4294901760, %v1153_v47 }
  0x21   :  { %243 = vmatpush.msra.mxu2 %v1038_v40  ;;  %291 = vmatpush.msra.mxu3 %v1007_v28  ;;  %v1186_v1 = vand.u32 4294901760, %v188_v55  ;;  %v200_v44 = vsub.f32 %v1139_v36, %v1166_v61 }
  0x22   :  { %154 = vmatpush.msra.mxu1 %v1088_v59  ;;  %97 = vmatpush.msra.mxu0 %v1027_v35  ;;  %v206_v55 = vsub.f32 %v1153_v47, %v1180_v7 }
  0x23   :  { %246 = vmatpush.msra.mxu2 %v1054_v46  ;;  %293 = vmatpush.msra.mxu3 %v1027_v35 }
  0x24   :  { %160 = vmatpush.msra.mxu1 %v1104_v2  ;;  %99 = vmatpush.msra.mxu0 %v1051_v45 }
  0x25   :  { %249 = vmatpush.msra.mxu2 %v1070_v52  ;;  %295 = vmatpush.msra.mxu3 %v1051_v45  ;;  %v112_v52 = vand.u32 4294901760, %v111_v48 }
  0x26   :  { %166 = vmatpush.msra.mxu1 %v1131_v30  ;;  %101 = vmatpush.msra.mxu0 %v1067_v51 }
  0x27   :  { %252 = vmatpush.msra.mxu2 %v1086_v58  ;;  %297 = vmatpush.msra.mxu3 %v1067_v51  ;;  %v1191_v58 = vand.u32 4294901760, %v1169_v60  ;;  %v113_v46 = vsub.f32 %v111_v48, %v112_v52 }
  0x28   :  { %172 = vmatpush.msra.mxu1 %v1148_v42  ;;  %103 = vmatpush.msra.mxu0 %v1074_v54 }
  0x29   :  { %255 = vmatpush.msra.mxu2 %v1102_v0  ;;  %299 = vmatpush.msra.mxu3 %v1074_v54  ;;  %v1197_v0 = vand.u32 4294901760, %v194_v31  ;;  %v212_v40 = vsub.f32 %v1169_v60, %v1191_v58  ;;  %v1212_v31 = vand.u32 4294901760, %v206_v55 }
  0x2a   :  { %178 = vmatpush.msra.mxu1 %v1161_v53  ;;  %105 = vmatpush.msra.mxu0 %v1099_v63 }
  0x2b   :  { %258 = vmatpush.msra.mxu2 %v1107_v6  ;;  %301 = vmatpush.msra.mxu3 %v1099_v63  ;;  %v1205_v6 = vand.u32 4294901760, %v200_v44  ;;  %v1218_v44 = vand.u32 4294901760, %v212_v40 }
  0x2c   :  { %184 = vmatpush.msra.mxu1 %v1175_v8  ;;  %107 = vmatpush.msra.mxu0 %v1120_v13 }
  0x2d   :  { %261 = vmatpush.msra.mxu2 %v1139_v36  ;;  %303 = vmatpush.msra.mxu3 %v1120_v13  ;;  %v114_v36 = vand.u32 4294901760, %v113_v46 }
  0x2e   :  { %190 = vmatpush.msra.mxu1 %v1186_v1  ;;  %109 = vmatpush.msra.mxu0 %v1125_v26 }
  0x2f   :  { %264 = vmatpush.msra.mxu2 %v1153_v47  ;;  %305 = vmatpush.msra.mxu3 %v1125_v26 }
  0x30   :  { %316 = vmatpush.msrb.mxu0 %v993_v22  ;;  %196 = vmatpush.msra.mxu1 %v1197_v0 }
  0x31   :  { %267 = vmatpush.msra.mxu2 %v1169_v60  ;;  %309 = vmatmul.f32.vlgmr.msra.gmra.mxu3 %v112_v52 }
  0x32   :  { %320 = vmatpush.msrb.mxu0 %v996_v23  ;;  %202 = vmatpush.msra.mxu1 %v1205_v6 }
  0x33   :  { %270 = vmatmul.f32.vlgmr.msra.gmra.mxu2 %v111_v48  ;;  %115 = vmatmul.f32.vlgmr.msra.gmra.mxu0 %v114_v36 }
  0x34   :  { %324 = vmatpush.msrb.mxu0 %v999_v24  ;;  %208 = vmatpush.msra.mxu1 %v1212_v31 }
  0x35   :  { %468 = vmatpush.msrb.mxu3 %v1030_v37  ;;  %423 = vmatpush.msrb.mxu2 %v957_v3 }
  0x36   :  { %328 = vmatpush.msrb.mxu0 %v1005_v27  ;;  %214 = vmatpush.msra.mxu1 %v1218_v44 }
  0x37   :  { %216 = vmatmul.f32.vlgmr.msra.gmra.mxu1 %v1123_v18  ;;  %474 = vmatpush.msrb.mxu3 %v1033_v38 }
  0x38   :  { %383 = vmatpush.msrb.mxu1 %v957_v3  ;;  %332 = vmatpush.msrb.mxu0 %v1021_v33 }
  0x39   :  { %480 = vmatpush.msrb.mxu3 %v1047_v43  ;;  %425 = vmatpush.msrb.mxu2 %v959_v4 }
  0x3a   :  { %385 = vmatpush.msrb.mxu1 %v959_v4  ;;  %336 = vmatpush.msrb.mxu0 %v1025_v34 }
  0x3b   :  { %486 = vmatpush.msrb.mxu3 %v1062_v49  ;;  %427 = vmatpush.msrb.mxu2 %v961_v5 }
  0x3c   :  { %387 = vmatpush.msrb.mxu1 %v961_v5  ;;  %340 = vmatpush.msrb.mxu0 %v1042_v41 }
  0x3d   :  { %492 = vmatpush.msrb.mxu3 %v1080_v56  ;;  %429 = vmatpush.msrb.mxu2 %v963_v9 }
  0x3e   :  { %389 = vmatpush.msrb.mxu1 %v963_v9  ;;  %344 = vmatpush.msrb.mxu0 %v1065_v50 }
  0x3f   :  { %498 = vmatpush.msrb.mxu3 %v1088_v59  ;;  %431 = vmatpush.msrb.mxu2 %v965_v10 }
  0x40   :  { %391 = vmatpush.msrb.mxu1 %v965_v10  ;;  %348 = vmatpush.msrb.mxu0 %v1083_v57 }
  0x41   :  { %504 = vmatpush.msrb.mxu3 %v1104_v2  ;;  %433 = vmatpush.msrb.mxu2 %v967_v11 }
  0x42   :  { %393 = vmatpush.msrb.mxu1 %v967_v11  ;;  %352 = vmatpush.msrb.mxu0 %v1097_v62 }
  0x43   :  { %510 = vmatpush.msrb.mxu3 %v1131_v30  ;;  %435 = vmatpush.msrb.mxu2 %v979_v17  ;;  %v812_v30 = vld [vmem:[%s1360_s2] ss:$0 sm:$0xff] }
  0x44   :  { %395 = vmatpush.msrb.mxu1 %v979_v17  ;;  %356 = vmatpush.msrb.mxu0 %v1118_v12 }
  0x45   :  { %516 = vmatpush.msrb.mxu3 %v1148_v42  ;;  %437 = vmatpush.msrb.mxu2 %v1001_v25 }
  0x46   :  { %397 = vmatpush.msrb.mxu1 %v1001_v25  ;;  %360 = vmatpush.msrb.mxu0 %v1136_v32 }
  0x47   :  { %522 = vmatpush.msrb.mxu3 %v1161_v53  ;;  %439 = vmatpush.msrb.mxu2 %v1007_v28 }
  0x48   :  { %399 = vmatpush.msrb.mxu1 %v1007_v28  ;;  %364 = vmatpush.msrb.mxu0 %v1142_v39 }
  0x49   :  { %528 = vmatpush.msrb.mxu3 %v1175_v8  ;;  %441 = vmatpush.msrb.mxu2 %v1027_v35 }
  0x4a   :  { %401 = vmatpush.msrb.mxu1 %v1027_v35  ;;  %368 = vmatpush.msrb.mxu0 %v1166_v61 }
  0x4b   :  { %534 = vmatpush.msrb.mxu3 %v1186_v1  ;;  %443 = vmatpush.msrb.mxu2 %v1051_v45 }
  0x4c   :  { %403 = vmatpush.msrb.mxu1 %v1051_v45  ;;  %372 = vmatpush.msrb.mxu0 %v1180_v7 }
  0x4d   :  { %540 = vmatpush.msrb.mxu3 %v1197_v0  ;;  %445 = vmatpush.msrb.mxu2 %v1067_v51 }
  0x4e   :  { %405 = vmatpush.msrb.mxu1 %v1067_v51  ;;  %376 = vmatpush.msrb.mxu0 %v1191_v58 }
  0x4f   :  { %378 = vmatmul.f32.vlgmr.msrb.gmra.mxu0 %v1123_v18  ;;  %546 = vmatpush.msrb.mxu3 %v1205_v6 }
  0x50   :  { %407 = vmatpush.msrb.mxu1 %v1074_v54  ;;  %566 = vmatpush.msra.mxu0 %v971_v14  ;;  %v1385_v14 = vld [vmem:[#allocation19_spill] sm:$0xff] }
  0x51   :  { %552 = vmatpush.msrb.mxu3 %v1212_v31  ;;  %447 = vmatpush.msrb.mxu2 %v1074_v54 }
  0x52   :  { %409 = vmatpush.msrb.mxu1 %v1099_v63  ;;  %569 = vmatpush.msra.mxu0 %v974_v15 }
  0x53   :  { %558 = vmatpush.msrb.mxu3 %v1218_v44  ;;  %449 = vmatpush.msrb.mxu2 %v1099_v63 }
  0x54   :  { %411 = vmatpush.msrb.mxu1 %v1120_v13  ;;  %572 = vmatpush.msra.mxu0 %v977_v16 }
  0x55   :  { %727 = vmatpush.msra.mxu3 %v957_v3  ;;  %451 = vmatpush.msrb.mxu2 %v1120_v13 }
  0x56   :  { %413 = vmatpush.msrb.mxu1 %v1125_v26  ;;  %575 = vmatpush.msra.mxu0 %v983_v19 }
  0x57   :  { %415 = vmatmul.f32.vlgmr.msrb.gmra.mxu1 %v1123_v18  ;;  %729 = vmatpush.msra.mxu3 %v959_v4 }
  0x58   :  { %619 = vmatpush.msra.mxu1 %v957_v3  ;;  %578 = vmatpush.msra.mxu0 %v986_v20  ;;  %v1379_v3 = vld [vmem:[#allocation12_spill] sm:$0xff] }
  0x59   :  { %731 = vmatpush.msra.mxu3 %v961_v5  ;;  %453 = vmatpush.msrb.mxu2 %v1125_v26 }
  0x5a   :  { %621 = vmatpush.msra.mxu1 %v959_v4  ;;  %581 = vmatpush.msra.mxu0 %v989_v21  ;;  %v1380_v4 = vld [vmem:[#allocation13_spill] sm:$0xff] }
  0x5b   :  { %733 = vmatpush.msra.mxu3 %v963_v9  ;;  %660 = vmatpush.msra.mxu2 %v993_v22 }
  0x5c   :  { %623 = vmatpush.msra.mxu1 %v961_v5  ;;  %584 = vmatpush.msra.mxu0 %v1010_v29  ;;  %v1381_v5 = vld [vmem:[#allocation14_spill] sm:$0xff] }
  0x5d   :  { %735 = vmatpush.msra.mxu3 %v965_v10  ;;  %664 = vmatpush.msra.mxu2 %v996_v23  ;;  %v1386_v29 = vld [vmem:[#allocation18_spill] sm:$0xff] }
  0x5e   :  { %625 = vmatpush.msra.mxu1 %v963_v9  ;;  %587 = vmatpush.msra.mxu0 %v1379_v3  ;;  %v1382_v9 = vld [vmem:[#allocation15_spill] sm:$0xff] }
  0x5f   :  { %737 = vmatpush.msra.mxu3 %v967_v11  ;;  %668 = vmatpush.msra.mxu2 %v999_v24 }
  0x60   :  { %627 = vmatpush.msra.mxu1 %v965_v10  ;;  %590 = vmatpush.msra.mxu0 %v1380_v4  ;;  %v1383_v10 = vld [vmem:[#allocation16_spill] sm:$0xff] }
  0x61   :  { %739 = vmatpush.msra.mxu3 %v979_v17  ;;  %672 = vmatpush.msra.mxu2 %v1005_v27 }
  0x62   :  { %629 = vmatpush.msra.mxu1 %v967_v11  ;;  %593 = vmatpush.msra.mxu0 %v1381_v5  ;;  %v1384_v11 = vld [vmem:[#allocation17_spill] sm:$0xff] }
  0x63   :  { %741 = vmatpush.msra.mxu3 %v1001_v25  ;;  %676 = vmatpush.msra.mxu2 %v1021_v33 }
  0x64   :  { %631 = vmatpush.msra.mxu1 %v979_v17  ;;  %596 = vmatpush.msra.mxu0 %v1382_v9 }
  0x65   :  { %743 = vmatpush.msra.mxu3 %v1007_v28  ;;  %680 = vmatpush.msra.mxu2 %v1025_v34 }
  0x66   :  { %633 = vmatpush.msra.mxu1 %v1001_v25  ;;  %599 = vmatpush.msra.mxu0 %v1383_v10 }
  0x67   :  { %745 = vmatpush.msra.mxu3 %v1027_v35  ;;  %684 = vmatpush.msra.mxu2 %v1042_v41 }
  0x68   :  { %635 = vmatpush.msra.mxu1 %v1007_v28  ;;  %602 = vmatpush.msra.mxu0 %v1384_v11 }
  0x69   :  { %747 = vmatpush.msra.mxu3 %v1051_v45  ;;  %688 = vmatpush.msra.mxu2 %v1065_v50 }
  0x6a   :  { %637 = vmatpush.msra.mxu1 %v1027_v35  ;;  %605 = vmatpush.msra.mxu0 %v1385_v14 }
  0x6b   :  { %749 = vmatpush.msra.mxu3 %v1067_v51  ;;  %692 = vmatpush.msra.mxu2 %v1083_v57 }
  0x6c   :  { %639 = vmatpush.msra.mxu1 %v1051_v45  ;;  %608 = vmatpush.msra.mxu0 %v1153_v47 }
  0x6d   :  { %751 = vmatpush.msra.mxu3 %v1074_v54  ;;  %696 = vmatpush.msra.mxu2 %v1097_v62 }
  0x6e   :  { %641 = vmatpush.msra.mxu1 %v1067_v51  ;;  %611 = vmatpush.msra.mxu0 %v1169_v60 }
  0x6f   :  { %753 = vmatpush.msra.mxu3 %v1099_v63  ;;  %700 = vmatpush.msra.mxu2 %v1118_v12 }
  0x70   :  { %643 = vmatpush.msra.mxu1 %v1074_v54 }
  0x71   :  { %755 = vmatpush.msra.mxu3 %v1120_v13  ;;  %704 = vmatpush.msra.mxu2 %v1136_v32 }
  0x72   :  { %645 = vmatpush.msra.mxu1 %v1099_v63 }
  0x73   :  { %757 = vmatpush.msra.mxu3 %v1125_v26  ;;  %708 = vmatpush.msra.mxu2 %v1142_v39 }
  0x74   :  { %647 = vmatpush.msra.mxu1 %v1120_v13  ;;  %v811_v13 = vld [vmem:[#allocation5] ss:$0 sm:$0xff] }
  0x75   :  { %712 = vmatpush.msra.mxu2 %v1166_v61 }
  0x76   :  { %649 = vmatpush.msra.mxu1 %v1125_v26 }
  0x77   :  { %716 = vmatpush.msra.mxu2 %v1180_v7 }
  0x79   :  { %720 = vmatpush.msra.mxu2 %v1191_v58 }
  0xb0   :  { %v116_v16 = vpop.f32.mrf.mxu0 }
  0xb4   :  { %v217_v15 = vpop.f32.mrf.mxu1  ;;  %v310_v21 = vpop.f32.mrf.mxu3 }
  0xb5   :  { %v218_v17 = vadd.f32 %v217_v15, %v116_v16 }
  0xb6   :  { %v271_v19 = vpop.f32.mrf.mxu2 }
  0xb7   :  { %v272_v20 = vadd.f32 %v271_v19, %v218_v17 }
  0xb9   :  { %v311_v22 = vadd.f32 %v310_v21, %v272_v20 }
  0xcc   :  { %v379_v23 = vpop.f32.mrf.mxu0 }
  0xcd   :  { %v380_v24 = vadd.f32 %v379_v23, %v311_v22 }
  0xd4   :  { %v416_v25 = vpop.f32.mrf.mxu1 }
  0xd5   :  { %v417_v27 = vadd.f32 %v416_v25, %v380_v24 }
  0xd7   :  { %v419_v28 = vmul.f32 0.03125, %v417_v27 }
  0xd9   :  { %v420_v33 = vsub.f32 %v1386_v29, %v419_v28 }
  0xdb   :  { %v421_v34 = vmul.f32 %v420_v33, %v420_v33 }
  0xdd   :  { %v454_v35 = vand.u32 4294901760, %v421_v34 }
  0xdf   :  { %v455_v37 = vsub.f32 %v421_v34, %v454_v35  ;;  %560 = vmatmul.f32.vlgmr.msrb.gmra.mxu3 %v454_v35 }
  0xe1   :  { %614 = vmatmul.f32.vlgmr.msra.gmra.mxu0 %v455_v37  ;;  %v456_v38 = vand.u32 4294901760, %v455_v37 }
  0xe3   :  { %653 = vmatmul.f32.vlgmr.msra.gmra.mxu1 %v456_v38  ;;  %v457_v40 = vsub.f32 %v455_v37, %v456_v38 }
  0xe5   :  { %v458_v41 = vand.u32 4294901760, %v457_v40 }
  0xe7   :  { %459 = vmatmul.f32.vlgmr.msrb.gmra.mxu2 %v458_v41  ;;  %759 = vmatmul.f32.vlgmr.msra.gmra.mxu3 %v454_v35 }
  0xef   :  { %722 = vmatmul.f32.vlgmr.msra.gmra.mxu2 %v454_v35 }
 0x15e   :  { %v615_v49 = vpop.f32.mrf.mxu0 }
 0x160   :  { %v654_v51 = vpop.f32.mrf.mxu1 }
 0x162   :  { %v561_v43 = vpop.f32.mrf.mxu3 }
 0x16a   :  { %v460_v45 = vpop.f32.mrf.mxu2  ;;  %v760_v57 = vpop.f32.mrf.mxu3 }
 0x16b   :  { %v562_v46 = vadd.f32 %v561_v43, %v460_v45 }
 0x16d   :  { %v616_v50 = vadd.f32 %v615_v49, %v562_v46 }
 0x16f   :  { %v655_v52 = vadd.f32 %v654_v51, %v616_v50 }
 0x172   :  { %v723_v54 = vpop.f32.mrf.mxu2 }
 0x173   :  { %v724_v56 = vadd.f32 %v723_v54, %v655_v52 }
 0x175   :  { %v761_v58 = vadd.f32 %v760_v57, %v724_v56 }
 0x177   :  { %v763_v59 = vmul.f32 0.03125, %v761_v58 }
 0x179   :  { %v764_v62 = vadd.f32 1e-06, %v763_v59 }
 0x17b   :  { %813 = vrsqrt.f32 %v764_v62  ;;  %vm771_vm1 = vweird.f32 %v764_v62 }
 0x181   :  { %v814_v63 = vpop.eup %813 }
 0x182   :  { %v766_v0 = vmul.f32 %v814_v63, %v764_v62  ;;  %vm772_vm0 = vweird.f32 %v814_v63 }
 0x183   :  { %vm773_vm2 = vmor %vm771_vm1, %vm772_vm0 }
 0x184   :  { %v767_v2 = vmul.f32 %v814_v63, %v766_v0 }
 0x186   :  { %v768_v6 = vmul.f32 0.5, %v767_v2 }
 0x188   :  { %v769_v7 = vsub.f32 1.5, %v768_v6 }
 0x18a   :  { %v770_v12 = vmul.f32 %v814_v63, %v769_v7 }
 0x18c   :  { %v774_v18 = vsel %vm773_vm2, %v814_v63, %v770_v12 }
 0x18d   :  { %v775_v26 = vmul.f32 %v774_v18, %v420_v33 }
 0x18f   :  { %v780_v32 = vmul.f32 %v811_v13, %v775_v26 }
 0x191   :  { %v785_v36 = vadd.f32 %v812_v30, %v780_v32 }
 0x193   :  { %786 = vst [vmem:[#allocation8] sm:$0xf] %v785_v36 }
 0x194   :  { %797 = dma.vmem_to_hbm [thread:$0]  %s793_s6, 64, %s795_s9, [#allocation4]  }
 0x195   :  { %915 = dma.done.wait [#allocation4], 64  }
 0x196   :  { %916 = vsyncadd [#allocation4], 4294967232 }
 0x197   :  { %802 = vsyncpa [#allocation3], 1 }
 0x198   :  { %803 = vsyncpa [#allocation6], 1 }
 0x199   :  { %804 = vsyncpa [#allocation4], 1 }

</bundles_post_ra>
